<compile_context>
chip_gen: v7x
topology: tpu7x:2x2x1
jax: 0.10.0
libtpu: 0.0.40
codegen_flags: <defaults>
</compile_context>

<pallas_src>
import functools

import jax
import jax.numpy as jnp
from jax.experimental import pallas as pl
from jax.experimental.pallas import tpu as pltpu

_LANE = 128
_HIGHEST = jax.lax.Precision.HIGHEST


def _vmem_budget_bytes():
    """Per-generation VMEM budget for this kernel (conservative across v5e/v6e/v7x)."""
    try:
        cap = int(pltpu.get_tpu_info().vmem_capacity_bytes)
    except Exception:
        cap = 64 * 1024 * 1024            # assume the smallest (v7x-like) if unknown
    # Use at most half of physical VMEM, clamped to [32 MiB, 96 MiB]:
    #   v5e / v6e (128 MiB physical) -> 64 MiB;  v7x (64 MiB physical) -> 32 MiB.
    return min(96 * 1024 * 1024, max(32 * 1024 * 1024, cap // 2))


# ---------------------------------------------------------------------------
# Fused single-pass path: pool + excite + scale in one HBM read + one write.
# ---------------------------------------------------------------------------
def _fused_kernel(x_ref, w1t_ref, b1_ref, w2t_ref, b2_ref, o_ref, *, inv_l):
    x_blk = x_ref[...]                                              # (Bn, C, L), input dtype
    # Squeeze: mean over L with f32 accumulation (no f32 copy of the slab).
    pooled = jnp.sum(x_blk, axis=-1, dtype=jnp.float32) * inv_l     # (Bn, C) f32
    # Excite: two 1x1 convs as small fp32 matmuls + ReLU + sigmoid.
    h = jnp.dot(pooled, w1t_ref[...].astype(jnp.float32),
                preferred_element_type=jnp.float32, precision=_HIGHEST)
    h = jnp.maximum(h + b1_ref[...], 0.0)                           # (Bn, Cr)
    s = jnp.dot(h, w2t_ref[...].astype(jnp.float32),
                preferred_element_type=jnp.float32, precision=_HIGHEST)
    gate = jax.nn.sigmoid(s + b2_ref[...])                          # (Bn, C) f32
    # Scale: per-(batch, channel) gate broadcast over L, multiply in input dtype.
    o_ref[...] = x_blk * gate.astype(o_ref.dtype)[:, :, None]


def _se_block_fused(x, w1t, b1r, w2t, b2r, *, block_n, vmem_limit):
    n, c, l = x.shape
    cr = w1t.shape[1]
    dtype = x.dtype
    itemsize = jnp.dtype(dtype).itemsize
    grid_n = pl.cdiv(n, block_n)

    cost = pl.CostEstimate(
        flops=2 * n * c * l + 4 * n * c * cr,
        transcendentals=n * c,
        bytes_accessed=2 * n * c * l * itemsize + (2 * c * cr + c + cr) * 4,
    )
    kernel = functools.partial(_fused_kernel, inv_l=float(1.0 / l))
    return pl.pallas_call(
        kernel,
        out_shape=jax.ShapeDtypeStruct((n, c, l), dtype),
        grid=(grid_n,),
        in_specs=[
            pl.BlockSpec((block_n, c, l), lambda i: (i, 0, 0)),     # x slab (full C, L)
            pl.BlockSpec((c, cr), lambda i: (0, 0)),                # W1^T
            pl.BlockSpec((1, cr), lambda i: (0, 0)),                # b1
            pl.BlockSpec((cr, c), lambda i: (0, 0)),                # W2^T
            pl.BlockSpec((1, c), lambda i: (0, 0)),                 # b2
        ],
        out_specs=pl.BlockSpec((block_n, c, l), lambda i: (i, 0, 0)),
        compiler_params=pltpu.CompilerParams(
            dimension_semantics=("parallel",),
            vmem_limit_bytes=vmem_limit,
        ),
        cost_estimate=cost,
    )(x, w1t, b1r, w2t, b2r)


# ---------------------------------------------------------------------------
# Two-pass L-tiled fallback for large C*L per batch element.
# ---------------------------------------------------------------------------
def _pool_kernel(x_ref, o_ref, *, true_l, tile_l, inv_l):
    li = pl.program_id(1)

    @pl.when(li == 0)
    def _init():
        o_ref[...] = jnp.zeros_like(o_ref)

    x_blk = x_ref[...]                                              # (1, C, tile_l)
    if true_l % tile_l != 0:
        # Mask the ragged tail of L so padding garbage never reaches the sum.
        pos = li * tile_l + jax.lax.broadcasted_iota(jnp.int32, x_blk.shape, 2)
        x_blk = jnp.where(pos < true_l, x_blk, jnp.zeros_like(x_blk))
    o_ref[...] += jnp.sum(x_blk, axis=-1, keepdims=True, dtype=jnp.float32)

    @pl.when(li == pl.num_programs(1) - 1)
    def _finalize():
        o_ref[...] = o_ref[...] * inv_l


def _scale_kernel(x_ref, gate_ref, o_ref):
    # gate block is (1, C, 1) f32 -> broadcast over the lane (L) axis.
    o_ref[...] = x_ref[...] * gate_ref[...].astype(o_ref.dtype)


def _se_block_two_pass(x, w1t, b1r, w2t, b2r, *, tile_l, vmem_limit):
    n, c, l = x.shape
    dtype = x.dtype
    itemsize = jnp.dtype(dtype).itemsize

    if tile_l is None:
        tile_bytes = max(2 * 1024 * 1024, vmem_limit // 8)
        tile_l = max(_LANE, (tile_bytes // (c * itemsize)) // _LANE * _LANE)
    if tile_l >= l:
        tile_l = l
    # TODO(synk): if C alone is so large that a (C, 128) tile exceeds the VMEM budget,
    # the channel axis would need tiling as well; not implemented here.
    grid = (n, pl.cdiv(l, tile_l))

    # Pass 1: L-tiled pooled mean, accumulated in f32 in the resident output block
    # (same output block index across the L grid axis).
    pooled3 = pl.pallas_call(
        functools.partial(_pool_kernel, true_l=l, tile_l=tile_l, inv_l=float(1.0 / l)),
        out_shape=jax.ShapeDtypeStruct((n, c, 1), jnp.float32),
        grid=grid,
        in_specs=[pl.BlockSpec((1, c, tile_l), lambda i, j: (i, 0, j))],
        out_specs=pl.BlockSpec((1, c, 1), lambda i, j: (i, 0, 0)),
        compiler_params=pltpu.CompilerParams(
            dimension_semantics=("parallel", "arbitrary"),
            vmem_limit_bytes=vmem_limit,
        ),
    )(x)

    # Tiny excite math (N x C) in plain JAX — not worth a kernel.
    pooled = pooled3[:, :, 0]                                               # (N, C) f32
    h = jnp.maximum(
        jnp.dot(pooled, w1t.astype(jnp.float32), precision=_HIGHEST) + b1r, 0.0)
    gate = jax.nn.sigmoid(
        jnp.dot(h, w2t.astype(jnp.float32), precision=_HIGHEST) + b2r)      # (N, C) f32
    gate3 = gate[:, :, None]                                                # (N, C, 1)

    # Pass 2: stream x again and apply the per-(batch, channel) gate.
    return pl.pallas_call(
        _scale_kernel,
        out_shape=jax.ShapeDtypeStruct((n, c, l), dtype),
        grid=grid,
        in_specs=[
            pl.BlockSpec((1, c, tile_l), lambda i, j: (i, 0, j)),
            pl.BlockSpec((1, c, 1), lambda i, j: (i, 0, 0)),
        ],
        out_specs=pl.BlockSpec((1, c, tile_l), lambda i, j: (i, 0, j)),
        compiler_params=pltpu.CompilerParams(
            dimension_semantics=("parallel", "parallel"),
            vmem_limit_bytes=vmem_limit,
        ),
    )(x, gate3)


# ---------------------------------------------------------------------------
# Public entry point.
# ---------------------------------------------------------------------------
def se_block(x, w1, b1, w2, b2, *, block_n=None, force_two_pass=False,
             two_pass_tile_l=None):
    """SE block forward.  x: (N, C, L).  w1: (Cr, C), b1: (Cr,), w2: (C, Cr),
    b2: (C,) — PyTorch Conv1d(kernel_size=1) weights with the trailing k dim squeezed."""
    n, c, l = x.shape
    cr = w1.shape[0]
    itemsize = jnp.dtype(x.dtype).itemsize

    # Present weights matmul-ready; biases as (1, out) fp32 rows.
    w1t = jnp.asarray(w1).T                                 # (C, Cr)
    w2t = jnp.asarray(w2).T                                 # (Cr, C)
    b1r = jnp.asarray(b1).reshape(1, cr).astype(jnp.float32)
    b2r = jnp.asarray(b2).reshape(1, c).astype(jnp.float32)

    vmem_limit = _vmem_budget_bytes()
    max_block_bytes = vmem_limit // 6                       # 2 in + 2 out buffers + slack
    per_elem_bytes = c * l * itemsize

    if force_two_pass or per_elem_bytes > max_block_bytes:
        # One batch element no longer fits the fused footprint: L-tiled two-pass path
        # (~1.5x HBM traffic, never spills / never exceeds the VMEM budget).
        return _se_block_two_pass(x, w1t, b1r, w2t, b2r,
                                  tile_l=two_pass_tile_l, vmem_limit=vmem_limit)

    if block_n is None:
        block_n = max(1, max_block_bytes // per_elem_bytes)
    # Keep >= 4 grid steps when the batch allows: >= 2 pipelined steps per TensorCore on
    # v7x (2 TCs), and DMA/compute overlap on single-TC v5e/v6e.  No N//2 cap otherwise.
    if n >= 4:
        block_n = min(block_n, n // 4)
    block_n = int(max(1, min(block_n, n)))
    # Prefer an even number of grid steps (v7x shards "parallel" axes across its 2 cores).
    while block_n > 1 and pl.cdiv(n, block_n) % 2 != 0:
        block_n -= 1
    return _se_block_fused(x, w1t, b1r, w2t, b2r,
                           block_n=block_n, vmem_limit=vmem_limit)


def se_block_ref(x, w1, b1, w2, b2):
    # Pure-JAX reference mirroring the PyTorch forward (fp32, HIGHEST-precision dots).
    pooled = jnp.mean(x.astype(jnp.float32), axis=-1)                       # (N, C)
    h = jnp.maximum(
        jnp.dot(pooled, w1.T.astype(jnp.float32), precision=_HIGHEST) + b1, 0.0)
    s = jnp.dot(h, w2.T.astype(jnp.float32), precision=_HIGHEST) + b2
    gate = jax.nn.sigmoid(s).astype(x.dtype)
    return x * gate[:, :, None]


if __name__ == "__main__":
    N, C, L = 4, 32, 100            # L deliberately NOT a multiple of 128 (no-pad path)
    reduction = 8
    Cr = C // reduction

    key = jax.random.PRNGKey(0)
    kx, k1, kb1, k2, kb2, kx2 = jax.random.split(key, 6)

    x = jax.random.normal(kx, (N, C, L), dtype=jnp.float32)
    # Conv1d(kernel_size=1) weights: (out_ch, in_ch, 1) with the kernel dim squeezed.
    w1 = jax.random.normal(k1, (Cr, C), dtype=jnp.float32) * 0.1
    b1 = jax.random.normal(kb1, (Cr,), dtype=jnp.float32) * 0.1
    w2 = jax.random.normal(k2, (C, Cr), dtype=jnp.float32) * 0.1
    b2 = jax.random.normal(kb2, (C,), dtype=jnp.float32) * 0.1

    # Fused single-pass path.
    out = jax.block_until_ready(se_block(x, w1, b1, w2, b2))
    ref = se_block_ref(x, w1, b1, w2, b2)
    assert out.shape == (N, C, L)
    assert jnp.allclose(out, ref, atol=2e-5, rtol=2e-5), "fused path mismatch vs reference"

    # L-tiled two-pass fallback (the large-C*L path), forced at a small shape so the
    # masked ragged L tail (200 = 128 + 72) is exercised too.
    x2 = jax.random.normal(kx2, (2, C, 200), dtype=jnp.float32)
    out2 = jax.block_until_ready(
        se_block(x2, w1, b1, w2, b2, force_two_pass=True, two_pass_tile_l=128))
    ref2 = se_block_ref(x2, w1, b1, w2, b2)
    assert out2.shape == x2.shape
    assert jnp.allclose(out2, ref2, atol=2e-5, rtol=2e-5), "two-pass path mismatch vs reference"

    print("KERNEL_OK")
</pallas_src>

<mosaic_0001>
module attributes {stable_mosaic.version = 11 : i64} {
  func.func @_fused_kernel(%arg0: i32, %arg1: memref<1x32x100xf32, #tpu.memory_space<vmem>>, %arg2: memref<32x4xf32, #tpu.memory_space<vmem>>, %arg3: memref<1x4xf32, #tpu.memory_space<vmem>>, %arg4: memref<4x32xf32, #tpu.memory_space<vmem>>, %arg5: memref<1x32xf32, #tpu.memory_space<vmem>>, %arg6: memref<1x32x100xf32, #tpu.memory_space<vmem>>) attributes {dimension_semantics = [#tpu.dimension_semantics<parallel>], iteration_bounds = array<i64: 4>, scalar_prefetch = 0 : i64, scratch_operands = 0 : i64, tpu.core_type = #tpu.core_type<tc>, window_params = [{transform_indices = @transform_0, window_bounds = array<i64: 1, 32, 100>}, {pipeline_mode = #tpu.pipeline_mode<synchronous>, transform_indices = @transform_1, window_bounds = array<i64: 32, 4>}, {pipeline_mode = #tpu.pipeline_mode<synchronous>, transform_indices = @transform_2, window_bounds = array<i64: 1, 4>}, {pipeline_mode = #tpu.pipeline_mode<synchronous>, transform_indices = @transform_3, window_bounds = array<i64: 4, 32>}, {pipeline_mode = #tpu.pipeline_mode<synchronous>, transform_indices = @transform_4, window_bounds = array<i64: 1, 32>}, {transform_indices = @transform_5, window_bounds = array<i64: 1, 32, 100>}]} {
    %c0 = arith.constant 0 : index
    %c0_0 = arith.constant 0 : index
    %c0_1 = arith.constant 0 : index
    %0 = vector.load %arg1[%c0, %c0_0, %c0_1] : memref<1x32x100xf32, #tpu.memory_space<vmem>>, vector<1x32x100xf32>
    %cst = arith.constant dense<0.000000e+00> : vector<1x32xf32>
    %1 = vector.multi_reduction <add>, %0, %cst [2] : vector<1x32x100xf32> to vector<1x32xf32>
    %cst_2 = arith.constant 0.00999999977 : f32
    %2 = vector.broadcast %cst_2 : f32 to vector<1x32xf32>
    %3 = arith.mulf %1, %2 : vector<1x32xf32>
    %c0_3 = arith.constant 0 : index
    %c0_4 = arith.constant 0 : index
    %4 = vector.load %arg2[%c0_3, %c0_4] : memref<32x4xf32, #tpu.memory_space<vmem>>, vector<32x4xf32>
    %cst_5 = arith.constant dense<0.000000e+00> : vector<1x4xf32>
    %5 = tpu.matmul %3, %4, %cst_5 {dimension_numbers = #tpu.dot_dimension_numbers<[1], [0], [0], [1], [0, 0, 1, 1], [], []>, precision = #tpu.contract_precision<fp32>} : vector<1x32xf32>, vector<32x4xf32>, vector<1x4xf32> -> vector<1x4xf32>
    %c0_6 = arith.constant 0 : index
    %c0_7 = arith.constant 0 : index
    %6 = vector.load %arg3[%c0_6, %c0_7] : memref<1x4xf32, #tpu.memory_space<vmem>>, vector<1x4xf32>
    %7 = arith.addf %5, %6 : vector<1x4xf32>
    %cst_8 = arith.constant 0.000000e+00 : f32
    %8 = vector.broadcast %cst_8 : f32 to vector<1x4xf32>
    %9 = arith.maximumf %7, %8 : vector<1x4xf32>
    %c0_9 = arith.constant 0 : index
    %c0_10 = arith.constant 0 : index
    %10 = vector.load %arg4[%c0_9, %c0_10] : memref<4x32xf32, #tpu.memory_space<vmem>>, vector<4x32xf32>
    %cst_11 = arith.constant dense<0.000000e+00> : vector<1x32xf32>
    %11 = tpu.matmul %9, %10, %cst_11 {dimension_numbers = #tpu.dot_dimension_numbers<[1], [0], [0], [1], [0, 0, 1, 1], [], []>, precision = #tpu.contract_precision<fp32>} : vector<1x4xf32>, vector<4x32xf32>, vector<1x32xf32> -> vector<1x32xf32>
    %c0_12 = arith.constant 0 : index
    %c0_13 = arith.constant 0 : index
    %12 = vector.load %arg5[%c0_12, %c0_13] : memref<1x32xf32, #tpu.memory_space<vmem>>, vector<1x32xf32>
    %13 = arith.addf %11, %12 : vector<1x32xf32>
    %14 = arith.negf %13 : vector<1x32xf32>
    %15 = math.exp %14 : vector<1x32xf32>
    %cst_14 = arith.constant 1.000000e+00 : f32
    %16 = vector.broadcast %cst_14 : f32 to vector<1x32xf32>
    %17 = arith.addf %16, %15 : vector<1x32xf32>
    %18 = arith.divf %16, %17 : vector<1x32xf32>
    %19 = vector.shape_cast %18 : vector<1x32xf32> to vector<1x32x1xf32>
    %20 = vector.broadcast %19 : vector<1x32x1xf32> to vector<1x32x100xf32>
    %21 = arith.mulf %0, %20 : vector<1x32x100xf32>
    %c0_15 = arith.constant 0 : index
    %c0_16 = arith.constant 0 : index
    %c0_17 = arith.constant 0 : index
    %22 = vector.load %arg6[%c0_15, %c0_16, %c0_17] : memref<1x32x100xf32, #tpu.memory_space<vmem>>, vector<1x32x100xf32>
    tpu.vector_store %arg6[%c0_15, %c0_16, %c0_17], %21 {strides = array<i32>} : memref<1x32x100xf32, #tpu.memory_space<vmem>>, vector<1x32x100xf32>,
    return
  }
  func.func @transform_0(%arg0: i32) -> (i32, i32, i32) {
    %c0_i32 = arith.constant 0 : i32
    %c0_i32_0 = arith.constant 0 : i32
    %c0_i32_1 = arith.constant 0 : i32
    return %arg0, %c0_i32, %c0_i32_0 : i32, i32, i32
  }
  func.func @transform_1(%arg0: i32) -> (i32, i32) {
    %c0_i32 = arith.constant 0 : i32
    %c0_i32_0 = arith.constant 0 : i32
    %c0_i32_1 = arith.constant 0 : i32
    return %c0_i32, %c0_i32_0 : i32, i32
  }
  func.func @transform_2(%arg0: i32) -> (i32, i32) {
    %c0_i32 = arith.constant 0 : i32
    %c0_i32_0 = arith.constant 0 : i32
    %c0_i32_1 = arith.constant 0 : i32
    return %c0_i32, %c0_i32_0 : i32, i32
  }
  func.func @transform_3(%arg0: i32) -> (i32, i32) {
    %c0_i32 = arith.constant 0 : i32
    %c0_i32_0 = arith.constant 0 : i32
    %c0_i32_1 = arith.constant 0 : i32
    return %c0_i32, %c0_i32_0 : i32, i32
  }
  func.func @transform_4(%arg0: i32) -> (i32, i32) {
    %c0_i32 = arith.constant 0 : i32
    %c0_i32_0 = arith.constant 0 : i32
    %c0_i32_1 = arith.constant 0 : i32
    return %c0_i32, %c0_i32_0 : i32, i32
  }
  func.func @transform_5(%arg0: i32) -> (i32, i32, i32) {
    %c0_i32 = arith.constant 0 : i32
    %c0_i32_0 = arith.constant 0 : i32
    %c0_i32_1 = arith.constant 0 : i32
    return %arg0, %c0_i32, %c0_i32_0 : i32, i32, i32
  }
}

</mosaic_0001>

<bundles_post_ra>
// kernel: tpu_custom_call.1
= control target key start
LH: loop header
LB: loop body
LE: loop exit
PB: predicated region body
PF: predicated region fallthrough
CT: control target
= control target key end

     0   :  { %10 = vsyncpa [#allocation3], 0  ;;  %s2059_s0 = inlined_call_operand.hbm [shape: f32[4,32,100], index: 0, kind: input, shape index: {}]   ;;  %s2060_s1 = inlined_call_operand.vmem [shape: f32[32,4], index: 1, kind: input, shape index: {}]   ;;  %s2061_s2 = inlined_call_operand.vmem [shape: f32[1,4], index: 2, kind: input, shape index: {}]   ;;  %s2062_s3 = inlined_call_operand.vmem [shape: f32[4,32], index: 3, kind: input, shape index: {}]   ;;  %s2063_s4 = inlined_call_operand.vmem [shape: f32[1,32], index: 4, kind: input, shape index: {}]   ;;  %s2064_s5 = inlined_call_operand.hbm [shape: f32[4,32,100], index: 5, kind: output, shape index: {}]  }
   0x1   :  { %12 = vsyncpa [#allocation3 + $0x1], 0 }
   0x2   :  { %13 = vsyncpa [#allocation4], 0 }
   0x3   :  { %15 = vsyncpa [#allocation4 + $0x1], 0  ;;  %s1771_s18 = smov 0   ;;  %s1773_s19 = smov 0  }
   0x4   :  { %s1775_s20 = smov 0   ;;  %s1777_s21 = smov 0  }
   0x5 LB: > { %s1792_s22 = sadd.s32 4294967295, %s1730_s21   ;;  %s1365_s23 = sadd.s32 4294967294, %s1730_s21   ;;  %s1730_s21 = sphi %s1777_s21, %s2076_s21   ;;  %s1726_s20 = sphi %s1775_s20, %s2075_s20   ;;  %s1722_s19 = sphi %s1773_s19, %s2074_s19   ;;  %s1718_s18 = sphi %s1771_s18, %s2073_s18  }
   0x6   : > { %s1796_s24 = sadd.s32 1, %s1730_s21   ;;  %s28_s25 = sadd.s32 1, %s1726_s20 }
   0x7   : > { %s25_s26 = ssub.s32 %s1730_s21, %s1796_s24  ;;  %p35_p0 = scmp.ne.s32.totalorder %s1726_s20, %s1722_s19 }
   0x8   : > { %p26_p1 = scmp.eq.s32.totalorder %s25_s26, 0  ;;  %p36_p2 = scmp.eq.s32.totalorder %s1730_s21, 0 }
   0x9   : > { %p41_p3 = scmp.ne.s32.totalorder %s1722_s19, %s1718_s18  ;;  %p42_p4 = scmp.eq.s32.totalorder %s1792_s22, 0 }
   0xa   : > { %s1808_s27 = scalar_select %p26_p1, %s1726_s20, %s28_s25  }
   0xb   : > { %p1810_p5 = por %p36_p2, %p35_p0  ;;  %p1814_p6 = por %p42_p4, %p41_p3 }
   0xc   : > { %p149_p7 = scmp.eq.s32.totalorder %s1792_s22, 3  ;;  %p155_p8 = scmp.eq.s32.totalorder %s1365_s23, 3 }
   0xd   : > { %p1589_p9 = scmp.lt.s32.totalorder %s1730_s21, 4  ;;  %s187_s7 = sand.u32 1, %s1726_s20  }
   0xe   : > { %p1820_p10 = por %p149_p7, %p35_p0  ;;  %p1824_p11 = por %p155_p8, %p41_p3 }
   0xf   : > { %s1380_s8 = sshll.u32 %s1730_s21, 9  ;;  %s1368_s9 = sshll.u32 %s187_s7, 5 }
  0x10   : > { %s2068_s30 = scalar_select %p1820_p10, 1, 0 }
  0x11   : > { %s2069_s6 = scalar_select %p1824_p11, 1, 0 }
  0x12   : > { %s1833_s12 = scalar_lea.hbm %s2059_s0, %s1380_s8  ;;  %s191_s13 = scalar_lea.vmem [#allocation2], %s1368_s9 }
  0x13   : > { %s198_s14 = sshll.u32 %s191_s13, 4  ;;  %p1837_p12 = pnand %p1589_p9, %p1810_p5  ;;  %s1841_s14 = int_to_ptr.vmem [resolvable:$true] %s198_s14 }
  0x14   : > { %s1843_s16 = scalar_lea.sflag [#allocation3], %s187_s7  ;;  %s1634_s17 = scalar_lea.hbm %s1833_s12, 512 }
  0x15   : > { %p1635_p13 = scmp.ne.s32.totalorder %s1833_s12, %s1634_s17  ;;  %p1636_p0 = pneg %p1837_p12 }
  0x16   : > { %s1639_s26 = scalar_lea.hbm %s2059_s0, 2048  ;;  %p1640_p3 = scmp.lt.u32.totalorder %s1833_s12, %s2059_s0 }
  0x17   : > { %p1637_p1 = pnand %p1636_p0, %p1635_p13  ;;  %p1641_p4 = scmp.lt.u32.totalorder %s1639_s26, %s1634_s17 }
  0x18   : > { %p1643_p7 = scmp.lt.u32.totalorder %s1634_s17, %s1833_s12 }
  0x19   : > { %p1638_p2 = pneg %p1637_p1  ;;  %p1642_p5 = por %p1641_p4, %p1640_p3 }
  0x1b   : > { %p1644_p8 = por %p1643_p7, %p1642_p5 }
  0x1d   : > { %p1645_p9 = pnand %p1644_p8, %p1638_p2 }
  0x1f   : > { %1648 = shalt.err (!%p1645_p9)
}
  0x20   : > { %s1649_s7 = scalar_lea.vmem %s1841_s14, 512  ;;  %s1732_s9 = smov [#allocation2]  }
  0x21   : > { %p1650_p13 = scmp.ne.s32.totalorder %s1841_s14, %s1649_s7  ;;  %s1654_s10 = sshll.u32 %s1732_s9, 4  ;;  %s1655_s10 = int_to_ptr.vmem [resolvable:$false] %s1654_s10 }
  0x22   : > { %s1656_s11 = scalar_lea.vmem %s1655_s10, 1024  ;;  %p1657_p10 = scmp.lt.s32.totalorder %s1841_s14, %s1655_s10 }
  0x23   : > { %p1652_p1 = pnand %p1650_p13, %p1636_p0  ;;  %p1658_p3 = scmp.lt.s32.totalorder %s1656_s11, %s1649_s7 }
  0x25   : > { %p1653_p11 = pneg %p1652_p1  ;;  %p1659_p4 = por %p1658_p3, %p1657_p10 }
  0x27   : > { %p1660_p5 = pnand %p1659_p4, %p1653_p11 }
  0x29   : > { %1663 = shalt.err (!%p1660_p5)
}
  0x2a   : > { %s1733_s13 = smov 128   ;;  %s1734_s17 = smov 8  }
  0x2b   : > { %1584 = dma.hbm_to_vmem [thread:$0]  (!%p1837_p12), %s1833_s12, 512, %s1841_s14, %s1843_s16, %s1733_s13, %s1733_s13, %s1734_s17  }
  0x2c   : > { %p1371_p0 = scmp.ge.s32.totalorder %s1730_s21, 1  ;;  %p206_p2 = scmp.lt.s32.totalorder %s1730_s21, 5 }
  0x2e   : > { %p207_p7 = pnand %p1371_p0, %p206_p2 }
  0x2f   : > { %s1874_s23 = sand.u32 (!%p207_p7), 1, %s1722_s19  }
  0x30   : > { %210 = sbr.rel (%p207_p7) target bundleno = 895 (0x37f), region = 40  ;;  %s1372_s25 = sshll.u32 (!%p207_p7), %s1874_s23, 5 }
  0x31   : > { %s213_s26 = scalar_lea.sflag (!%p207_p7), [#allocation3], %s1874_s23  ;;  %s216_s28 = scalar_lea.vmem (!%p207_p7), [#allocation2], %s1372_s25 }
  0x37   : > { %1709 = dma.done.wait (%p1814_p6), %s213_s26, 512  }
  0x38   : > { %1711 = vsyncadd (%p1814_p6), %s213_s26, 4294966784  ;;  %vm247_vm0 = vcmask 818176   ;;  %v1884_v0 = vld [vmem:[%s216_s28] sm:$0xff]  ;;  %v1886_v1 = vld [vmem:[%s216_s28 + $0x10] sm:$0xff]  ;;  %v1735_v31 = vmov 0.0|0.0   ;;  %vm1736_vm1 = vmmov 0   ;;  %v273_v42 = vlaneseq }
  0x39   : > { %v1888_v2 = vld [vmem:[%s216_s28 + $0x8] sm:$0xff]  ;;  %v248_v3 = vsel %vm247_vm0, %v1884_v0, 0.0  ;;  %v254_v4 = vsel %vm247_vm0, %v1886_v1, 0.0  ;;  %v1894_v5 = vld [vmem:[%s216_s28 + $0x18] sm:$0xff]  ;;  %v264_v8 = vld [vmem:[%s2060_s1] sm:$0xff]  ;;  %1526 = vmatprep.subr.bf16.mxu0 %v1735_v31  ;;  %1520 = vmatprep.subr.bf16.mxu1 %v1735_v31  ;;  %v1737_v35 = vmov 0.0  }
  0x3a   : > { %249 = vadd.xlane.f32.xlu0 %v248_v3  ;;  %255 = vadd.xlane.f32.xlu1 %v254_v4  ;;  %v251_v6 = vsel %vm247_vm0, %v1888_v2, 0.0  ;;  %v257_v7 = vsel %vm247_vm0, %v1894_v5, 0.0  ;;  %v265_v9 = vld [vmem:[%s2060_s1 + $0x8] sm:$0xff]  ;;  %v304_v10 = vand.u32 4294901760, %v264_v8  ;;  %v266_v14 = vld [vmem:[%s2060_s1 + $0x10] sm:$0xff]  ;;  %v267_v15 = vld [vmem:[%s2060_s1 + $0x18] sm:$0xff] }
  0x3b   : > { %v307_v11 = vand.u32 4294901760, %v265_v9  ;;  %v310_v18 = vand.u32 4294901760, %v266_v14  ;;  %v313_v19 = vand.u32 4294901760, %v267_v15  ;;  %1443 = vmatprep.mubr.msk.f32.mxu0 %vm1736_vm1, %v1737_v35  ;;  %1432 = vmatprep.mubr.msk.f32.mxu1 %vm1736_vm1, %v1737_v35  ;;  %v274_v43 = vand.u32 127, %v273_v42  ;;  %s242_s29 = scalar_lea.vmem [#allocation5], %s1372_s25  ;;  %s1381_s14 = sshll.u32 %s1792_s22, 9 }
  0x3c   : > { %v1906_v12 = vsub.f32 %v264_v8, %v304_v10  ;;  %v1948_v44 = vshrl.u32 %v273_v42, 7  ;;  %vm284_vm2 = vcmask 130112   ;;  %vm291_vm3 = vcmask 195712   ;;  %s1292_s12 = sshll.u32 %s242_s29, 4  ;;  %s2014_s16 = scalar_lea.hbm %s2064_s5, %s1381_s14  ;;  %s2008_s12 = int_to_ptr.vmem [resolvable:$true] %s1292_s12 }
  0x3d   : > { %v1908_v13 = vsub.f32 %v265_v9, %v307_v11  ;;  %v1920_v22 = vsub.f32 %v266_v14, %v310_v18  ;;  %v1922_v23 = vsub.f32 %v267_v15, %v313_v19  ;;  %v1936_v37 = vpack.c.bf16 %v307_v11, %v304_v10  ;;  %s1279_s8 = scalar_lea.sflag [#allocation4], %s1874_s23  ;;  %s1664_s7 = scalar_lea.vmem %s2008_s12, 512 }
  0x3e   : > { %252 = vadd.xlane.f32.xlu0 %v251_v6  ;;  %258 = vadd.xlane.f32.xlu1 %v257_v7  ;;  %v385_v16 = vand.u32 4294901760, %v1906_v12  ;;  %v1944_v39 = vpack.c.bf16 %v313_v19, %v310_v18  ;;  %v279_v45 = vadd.s32 4294967288, %v274_v43  ;;  %v293_v46 = vadd.s32 4294967272, %v274_v43  ;;  %v268_v18 = vld [vmem:[%s2061_s2] sm:$0x1]  ;;  %p1665_p6 = scmp.ne.s32.totalorder %s2008_s12, %s1664_s7  ;;  %p2071_p10 = scmp.ne.s32.totalorder %s2068_s30, 0 }
  0x3f   : > { %v392_v17 = vand.u32 4294901760, %v1908_v13  ;;  %v399_v26 = vand.u32 4294901760, %v1920_v22  ;;  %v406_v27 = vand.u32 4294901760, %v1922_v23  ;;  %v1533_v36 = vpack.c.bf16 %v1908_v13, %v1906_v12  ;;  %1522 = vmatpush3.bf16.msra.mxu1 %v1936_v37  ;;  %s1738_s22 = smov [#allocation5]  }
  0x40   : > { %v386_v20 = vsub.f32 %v1906_v12, %v385_v16  ;;  %1523 = vmatprep.subr.bf16.mxu1 %v1735_v31  ;;  %v1536_v38 = vpack.c.bf16 %v1922_v23, %v1920_v22  ;;  %v286_v48 = vadd.s32 4294967280, %v274_v43  ;;  %v277_v50 = vsub.s32 %v274_v43, %v1948_v44  ;;  %p1666_p11 = pnand %p1665_p6, %p2071_p10  ;;  %s1668_s9 = sshll.u32 %s1738_s22, 4  ;;  %s1669_s9 = int_to_ptr.vmem [resolvable:$false] %s1668_s9 }
  0x41   : > { %v393_v21 = vsub.f32 %v1908_v13, %v392_v17  ;;  %v400_v29 = vsub.f32 %v1920_v22, %v399_v26  ;;  %v407_v30 = vsub.f32 %v1922_v23, %v406_v27  ;;  %v1545_v40 = vpack.c.bf16 %v392_v17, %v385_v16  ;;  %v789_v13 = vld [vmem:[%s2062_s3] sm:$0xf]  ;;  %s1670_s10 = scalar_lea.vmem %s1669_s9, 1024  ;;  %p1671_p8 = scmp.lt.s32.totalorder %s2008_s12, %s1669_s9 }
  0x42   : > { %v387_v24 = vand.u32 4294901760, %v386_v20  ;;  %v1548_v41 = vpack.c.bf16 %v406_v27, %v399_v26  ;;  %v282_v52 = vsub.s32 %v279_v45, %v1948_v44  ;;  %v296_v53 = vsub.s32 %v293_v46, %v1948_v44  ;;  %p1667_p12 = pneg %p1666_p11  ;;  %p1672_p9 = scmp.lt.s32.totalorder %s1670_s10, %s1664_s7 }
  0x43   : > { %v394_v25 = vand.u32 4294901760, %v393_v21  ;;  %v401_v32 = vand.u32 4294901760, %v400_v29  ;;  %v408_v33 = vand.u32 4294901760, %v407_v30  ;;  %1525 = vmatpush3.bf16.msra.mxu1 %v1944_v39  ;;  %v289_v54 = vsub.s32 %v286_v48, %v1948_v44 }
  0x44   : > { %1490 = vmatprep.subr.mxu1 %v1737_v35  ;;  %vm298_vm4 = vcmask 261312   ;;  %vm300_vm5 = vcmask 261120   ;;  %vm795_vm6 = vcmask 1043456   ;;  %vm791_vm7 = vcmask 31744   ;;  %p1673_p13 = por %p1672_p9, %p1671_p8 }
  0x45   : > { %v1527_v28 = vpack.c.bf16 %v394_v25, %v387_v24  ;;  %v1530_v34 = vpack.c.bf16 %v408_v33, %v401_v32  ;;  %v797_v14 = vsel %vm795_vm6, %v789_v13, 0  ;;  %v1253_v42 = vsub.s32 0, %v1948_v44 }
  0x46   : > { %v800_v15 = vand.u32 4294901760, %v797_v14  ;;  %p1674_p1 = pnand %p1673_p13, %p1667_p12 }
  0x47   : > { %1528 = vmatpush3.bf16.msra.mxu0 %v1527_v28 }
  0x48   : > { %1529 = vmatprep.subr.bf16.mxu0 %v1735_v31  ;;  %v877_v23 = vsub.f32 %v797_v14, %v800_v15 }
  0x4a   : > { %v878_v26 = vand.u32 4294901760, %v877_v23 }
  0x4b   : > { %1531 = vmatpush3.bf16.msra.mxu0 %v1530_v34  ;;  %v790_v34 = vld [vmem:[%s2063_s4] sm:$0x1] }
  0x4c   : > { %1532 = vmatprep.subr.bf16.mxu0 %v1735_v31  ;;  %v879_v29 = vsub.f32 %v877_v23, %v878_v26 }
  0x4e   : > { %v880_v32 = vand.u32 4294901760, %v879_v29 }
  0xc7   : > { %v250_v47 = vpop.xlane.xlu0 %249  ;;  %v256_v49 = vpop.xlane.xlu1 %255 }
  0xc8   : > { %v260_v51 = vmul.f32 0.01, %v250_v47  ;;  %v262_v55 = vmul.f32 0.01, %v256_v49 }
  0xca   : > { %v278_v60 = vrot.slane %v260_v51, %v277_v50  ;;  %v290_v63 = vrot.slane %v262_v55, %v289_v54 }
  0xcb   : > { %v253_v56 = vpop.xlane.xlu0 %252  ;;  %v259_v57 = vpop.xlane.xlu1 %258 }
  0xcc   : > { %v261_v58 = vmul.f32 0.01, %v253_v56  ;;  %v263_v59 = vmul.f32 0.01, %v259_v57 }
  0xce   : > { %v283_v61 = vrot.slane %v261_v58, %v282_v52  ;;  %v297_v62 = vrot.slane %v263_v59, %v296_v53 }
  0xd0   : > { %v285_v3 = vsel %vm284_vm2, %v283_v61, %v278_v60 }
  0xd1   : > { %v292_v4 = vsel %vm291_vm3, %v290_v63, %v285_v3 }
  0xd2   : > { %v299_v6 = vsel %vm298_vm4, %v297_v62, %v292_v4 }
  0xd3   : > { %v301_v7 = vsel %vm300_vm5, %v299_v6, 0 }
  0xd4   : > { %v372_v8 = vand.u32 4294901760, %v301_v7 }
  0xd6   : > { %1444 = vmatmul.mubr.f32.vlgmr.msra.gmra.mrb[0].mxu0 %v372_v8  ;;  %v373_v9 = vsub.f32 %v301_v7, %v372_v8 }
  0xd7   : > { %1534 = vmatpush3.bf16.msra.mxu0 %v1533_v36  ;;  %1454 = vmatprep.mubr.msk.f32.mxu0 %vm1736_vm1, %v1737_v35 }
  0xd8   : > { %1535 = vmatprep.subr.bf16.mxu0 %v1735_v31  ;;  %v374_v10 = vand.u32 4294901760, %v373_v9 }
  0xda   : > { %v375_v11 = vsub.f32 %v373_v9, %v374_v10 }
  0xdb   : > { %1537 = vmatpush3.bf16.msra.mxu0 %v1536_v38 }
  0xdc   : > { %1538 = vmatprep.subr.bf16.mxu0 %v1735_v31  ;;  %v376_v12 = vand.u32 4294901760, %v375_v11 }
  0xde   : > { %1433 = vmatmul.mubr.f32.vlgmr.msra.gmra.mrb[0].mxu1 %v376_v12  ;;  %1455 = vmatmul.mubr.f32.vlgmr.msra.gmra.mrb[0].mxu0 %v373_v9 }
  0xdf   : > { %1540 = vmatpush3.bf16.msra.mxu0 %v1936_v37  ;;  %1465 = vmatprep.mubr.msk.f32.mxu0 %vm1736_vm1, %v1737_v35 }
  0xe0   : > { %1541 = vmatprep.subr.bf16.mxu0 %v1735_v31  ;;  %1492 = vmatprep.mubr.msk.f32.mxu1 %vm1736_vm1, %v1737_v35 }
  0xe1   : > { %1491 = vmatpush3.msra.mxu1 %v800_v15 }
  0xe2   : > { %1495 = vmatprep.subr.mxu1 %v1737_v35 }
  0xe3   : > { %1543 = vmatpush3.bf16.msra.mxu0 %v1944_v39 }
  0xe4   : > { %1544 = vmatprep.subr.bf16.mxu0 %v1735_v31 }
  0xe6   : > { %1466 = vmatmul.mubr.f32.vlgmr.msra.gmra.mrb[0].mxu0 %v374_v10 }
  0xe7   : > { %1546 = vmatpush3.bf16.msra.mxu0 %v1545_v40  ;;  %1476 = vmatprep.mubr.msk.f32.mxu0 %vm1736_vm1, %v1737_v35 }
  0xe8   : > { %1547 = vmatprep.subr.bf16.mxu0 %v1735_v31 }
  0xeb   : > { %1549 = vmatpush3.bf16.msra.mxu0 %v1548_v41 }
  0xec   : > { %1550 = vmatprep.subr.bf16.mxu0 %v1735_v31 }
  0xee   : > { %1477 = vmatmul.mubr.f32.vlgmr.msra.gmra.mrb[0].mxu0 %v372_v8 }
  0xef   : > { %1552 = vmatpush3.bf16.msra.mxu0 %v1936_v37  ;;  %1487 = vmatprep.mubr.msk.f32.mxu0 %vm1736_vm1, %v1737_v35 }
  0xf0   : > { %1553 = vmatprep.subr.bf16.mxu0 %v1735_v31 }
  0xf3   : > { %1555 = vmatpush3.bf16.msra.mxu0 %v1944_v39 }
  0xf6   : > { %1488 = vmatmul.mubr.f32.vlgmr.msra.gmra.mrb[0].mxu0 %v372_v8 }
 0x1b1   : > { %v378_v16 = vpop.f32.mrb[0].mxu1 }
 0x1b2   : > { %v1434_v17 = vpop.f32.mrb[1].mxu1  ;;  %v379_v19 = vadd.f32 %v378_v16, %v268_v18 }
 0x1c9   : > { %v784_v20 = vpop.f32.mrb[0].mxu0 }
 0x1ca   : > { %v1557_v21 = vadd.f32 %v784_v20, %v379_v19  ;;  %v1489_v22 = vpop.f32.mrb[1].mxu0 }
 0x1cc   : > { %v788_v24 = vmax.f32 %v1557_v21, 0.0 }
 0x1ce   : > { %v793_v25 = vsel %vm791_vm7, %v788_v24, 0 }
 0x1cf   : > { %v865_v27 = vand.u32 4294901760, %v793_v25 }
 0x1d1   : > { %v866_v28 = vsub.f32 %v793_v25, %v865_v27 }
 0x1d3   : > { %v867_v30 = vand.u32 4294901760, %v866_v28 }
 0x1d5   : > { %v868_v31 = vsub.f32 %v866_v28, %v867_v30 }
 0x1d7   : > { %v869_v33 = vand.u32 4294901760, %v868_v31 }
 0x1d9   : > { %1493 = vmatmul.mubr.f32.vlgmr.msra.gmra.mrb[2].mxu1 %v869_v33 }
 0x1da   : > { %1496 = vmatpush3.msra.mxu1 %v880_v32  ;;  %1497 = vmatprep.mubr.msk.f32.mxu1 %vm1736_vm1, %v1737_v35 }
 0x1db   : > { %1500 = vmatprep.subr.mxu1 %v1737_v35 }
 0x1e1   : > { %1498 = vmatmul.mubr.f32.vlgmr.msra.gmra.mrb[2].mxu1 %v865_v27 }
 0x1e2   : > { %1501 = vmatpush3.msra.mxu1 %v877_v23  ;;  %1502 = vmatprep.mubr.msk.f32.mxu1 %vm1736_vm1, %v1737_v35 }
 0x1e3   : > { %1505 = vmatprep.subr.mxu1 %v1737_v35 }
 0x1e9   : > { %1503 = vmatmul.mubr.f32.vlgmr.msra.gmra.mrb[2].mxu1 %v866_v28 }
 0x1ea   : > { %1506 = vmatpush3.msra.mxu1 %v800_v15  ;;  %1507 = vmatprep.mubr.msk.f32.mxu1 %vm1736_vm1, %v1737_v35 }
 0x1eb   : > { %1510 = vmatprep.subr.mxu1 %v1737_v35 }
 0x1f1   : > { %1508 = vmatmul.mubr.f32.vlgmr.msra.gmra.mrb[2].mxu1 %v867_v30 }
 0x1f2   : > { %1511 = vmatpush3.msra.mxu1 %v878_v26  ;;  %1512 = vmatprep.mubr.msk.f32.mxu1 %vm1736_vm1, %v1737_v35 }
 0x1f3   : > { %1515 = vmatprep.subr.mxu1 %v1737_v35 }
 0x1f9   : > { %1513 = vmatmul.mubr.f32.vlgmr.msra.gmra.mrb[2].mxu1 %v865_v27 }
 0x1fa   : > { %1516 = vmatpush3.msra.mxu1 %v800_v15  ;;  %1517 = vmatprep.mubr.msk.f32.mxu1 %vm1736_vm1, %v1737_v35 }
 0x201   : > { %1518 = vmatmul.mubr.f32.vlgmr.msra.gmra.mrb[2].mxu1 %v865_v27 }
 0x2d4   : > { %v1241_v36 = vpop.f32.mrb[2].mxu1 }
 0x2d5   : > { %v1558_v37 = vadd.f32 %v1241_v36, %v790_v34  ;;  %v1519_v38 = vpop.f32.mrb[3].mxu1 }
 0x2d7   : > { %v1374_v39 = vmul.f32 -1.442695, %v1558_v37 }
 0x2d9   : > { %1630 = vpow2.f32 %v1374_v39 }
 0x2e3   : > { %v1631_v40 = vpop.eup %1630 }
 0x2e4   : > { %v1248_v41 = vadd.f32 1.0, %v1631_v40 }
 0x2e6   : > { %1632 = vrcp.f32 %v1248_v41 }
 0x2f0   : > { %v1633_v43 = vpop.eup %1632 }
 0x2f1   : > { %v1254_v45 = vrot.slane %v1633_v43, %v1253_v42 }
 0x2f3   : > { %1260 = vbcast.lane.b32.xlu1 %v1254_v45, 264  ;;  %1256 = vbcast.lane.b32.xlu0 %v1254_v45, 256 }
 0x2f7   : > { %1264 = vbcast.lane.b32.xlu1 %v1254_v45, 272 }
 0x2fb   : > { %1268 = vbcast.lane.b32.xlu1 %v1254_v45, 280 }
 0x365   : > { %v1261_v35 = vpop.permute.xlu1 %1260  ;;  %v1257_v46 = vpop.permute.xlu0 %1256 }
 0x366   : > { %v1271_v47 = vmul.f32 %v1261_v35, %v1888_v2  ;;  %v1270_v48 = vmul.f32 %v1257_v46, %v1884_v0 }
 0x368   : > { %1275 = vst.msk [vmem:[%s242_s29 + $0x8] sm:$0xff] %vm247_vm0, %v1271_v47  ;;  %1274 = vst.msk [vmem:[%s242_s29] sm:$0xff] %vm247_vm0, %v1270_v48 }
 0x369   : > { %v1265_v44 = vpop.permute.xlu1 %1264 }
 0x36a   : > { %v1272_v49 = vmul.f32 %v1265_v44, %v1886_v1 }
 0x36c   : > { %1276 = vst.msk [vmem:[%s242_s29 + $0x10] sm:$0xff] %vm247_vm0, %v1272_v49 }
 0x36d   : > { %v1269_v0 = vpop.permute.xlu1 %1268 }
 0x36e   : > { %v1273_v2 = vmul.f32 %v1269_v0, %v1894_v5 }
 0x370   : > { %1277 = vst.msk [vmem:[%s242_s29 + $0x18] sm:$0xff] %vm247_vm0, %v1273_v2 }
 0x371   : > { %1677 = shalt.err (!%p1674_p1)
}
 0x372   : > { %s1678_s11 = scalar_lea.hbm %s2014_s16, 512  ;;  %s1682_s26 = scalar_lea.hbm %s2064_s5, 2048 }
 0x373   : > { %p1679_p3 = scmp.ne.s32.totalorder %s2014_s16, %s1678_s11  ;;  %p1683_p0 = scmp.lt.u32.totalorder %s2014_s16, %s2064_s5 }
 0x374   : > { %p1684_p2 = scmp.lt.u32.totalorder %s1682_s26, %s1678_s11  ;;  %p1686_p6 = scmp.lt.u32.totalorder %s1678_s11, %s2014_s16 }
 0x375   : > { %p1680_p4 = pnand %p1679_p3, %p2071_p10 }
 0x376   : > { %p1685_p7 = por %p1684_p2, %p1683_p0 }
 0x377   : > { %p1681_p5 = pneg %p1680_p4 }
 0x378   : > { %p1687_p11 = por %p1686_p6, %p1685_p7 }
 0x37a   : > { %p1688_p12 = pnand %p1687_p11, %p1681_p5 }
 0x37c   : > { %1691 = shalt.err (!%p1688_p12)
}
 0x37d   : > { %s1739_s14 = smov 128   ;;  %s1740_s15 = smov 8  }
 0x37e   : > { %1579 = dma.vmem_to_hbm [thread:$0]  (%p2071_p10), %s2008_s12, 512, %s2014_s16, %s1279_s8, %s1739_s14, %s1739_s14, %s1740_s15  }
 0x37f PF: > { %p1590_p8 = scmp.ge.s32.totalorder %s1730_s21, 2  ;;  %s1307_s25 = sand.u32 1, %s1718_s18  }
 0x380   : > { %p2072_p9 = scmp.ne.s32.totalorder %s2069_s6, 0  ;;  %s1308_s7 = scalar_lea.sflag [#allocation4], %s1307_s25 }
 0x382   : > { %p1586_p13 = pnand %p1590_p8, %p2072_p9 }
 0x384   : > { %1713 = dma.done.wait (!%p1586_p13), %s1308_s7, 512  }
 0x385   : > { %1715 = vsyncadd (!%p1586_p13), %s1308_s7, 4294966784  ;;  %p18_p1 = scmp.ge.s32.totalorder %s1796_s24, 6   ;;  %s2073_s18 = smov %s1722_s19 }
 0x386   : > { %s2074_s19 = smov %s1726_s20  ;;  %s2075_s20 = smov %s1808_s27 }
 0x387   : > { %s2076_s21 = smov %s1796_s24  ;;  %20 = sbr.rel (!%p18_p1) target bundleno = 5 (0x5), region = 85 }
 0x38e   :  { %1313 = vsyncpa [#allocation3], 1 }
 0x38f   :  { %1315 = vsyncpa [#allocation3 + $0x1], 1 }
 0x390   :  { %1316 = vsyncpa [#allocation4], 1 }
 0x391   :  { %1318 = vsyncpa [#allocation4 + $0x1], 1 }

</bundles_post_ra>
